<compile_context>
chip_gen: v5e
topology: v5e:2x2
jax: 0.10.0
libtpu: 0.0.40
codegen_flags: <defaults>
</compile_context>

<pallas_src>
import functools

import jax
import jax.numpy as jnp
from jax.experimental import pallas as pl
from jax.experimental.pallas import tpu as pltpu


# ---------------------------------------------------------------------------
# Kernel helpers (operate on rank-3 NCHW channel tiles: (C_tile, H, W)).
def _pad_hw_zero(x, padding):
    """Zero-pad the last two (H, W) axes of a (Ct, H, W) f32 tile, in vregs."""
    if padding == 0:
        return x
    ct, h, w = x.shape
    zcol = jnp.zeros((ct, h, padding), x.dtype)
    x = jnp.concatenate([zcol, x, zcol], axis=2)        # lane-axis concat (XLU)
    zrow = jnp.zeros((ct, padding, w + 2 * padding), x.dtype)
    x = jnp.concatenate([zrow, x, zrow], axis=1)        # sublane-axis concat
    return x


def _separable_pool_sum(xp, kernel_size, stride, out_h, out_w):
    """Sum k x k windows of xp (shape (Ct, Hp, Wp), f32): W pass then H pass."""
    _, hp, wp = xp.shape
    w_span = wp - kernel_size + 1
    h_span = hp - kernel_size + 1
    # W direction (lane axis): k shifted adds -> (Ct, Hp, w_span)
    row = xp[:, :, 0:w_span]
    for kw in range(1, kernel_size):
        row = row + xp[:, :, kw:kw + w_span]
    # H direction (sublane axis): k shifted adds -> (Ct, h_span, w_span)
    acc = row[:, 0:h_span, :]
    for kh in range(1, kernel_size):
        acc = acc + row[:, kh:kh + h_span, :]
    if stride > 1:
        acc = acc[:, ::stride, ::stride]
    if acc.shape[1] != out_h or acc.shape[2] != out_w:
        acc = acc[:, :out_h, :out_w]
    return acc


# ---------------------------------------------------------------------------
# Kernels.
def _avgpool_kernel(x_ref, o_ref, *, kernel_size, stride, padding, out_h, out_w):
    x = x_ref[...].astype(jnp.float32)
    xp = _pad_hw_zero(x, padding)
    acc = _separable_pool_sum(xp, kernel_size, stride, out_h, out_w)
    o_ref[...] = (acc * (1.0 / float(kernel_size * kernel_size))).astype(o_ref.dtype)


def _quant_avgpool_kernel(scale_ref, x_ref, o_ref, *, kernel_size, stride,
                          padding, out_h, out_w):
    scale = scale_ref[0]                      # activation scale (scalar, SMEM)
    # ste_round forward == torch.round (round-half-to-even, same as jnp.round).
    x_int = jnp.round(x_ref[...].astype(jnp.float32) / scale)
    xp = _pad_hw_zero(x_int, padding)
    acc = _separable_pool_sum(xp, kernel_size, stride, out_h, out_w)
    pooled = acc / float(kernel_size * kernel_size)
    # transfer_float_averaging_to_int_averaging: force an integer average result.
    o_ref[...] = (jnp.round(pooled) * scale).astype(o_ref.dtype)


# ---------------------------------------------------------------------------
# Tile / VMEM sizing.
def _vmem_capacity_bytes():
    try:
        return int(pltpu.get_tpu_info().vmem_capacity_bytes)
    except Exception:
        return 64 * 1024 * 1024        # v7x per-TensorCore VMEM (smallest gen)


def _per_step_vmem_bytes(tc, h, w, hp, wp, out_h, out_w, in_isz, out_isz):
    in_b = 2 * tc * h * w * in_isz                 # double-buffered input block
    pad_b = tc * hp * wp * 4                       # padded f32 working copy
    row_b = tc * hp * wp * 4                       # W-pass intermediate (upper bound)
    acc_b = tc * out_h * out_w * 4                 # accumulator
    out_b = 2 * tc * out_h * out_w * out_isz       # double-buffered output block
    return in_b + pad_b + row_b + acc_b + out_b


def _pick_channel_tile(n, c, h, w, hp, wp, out_h, out_w, in_isz, out_isz):
    cap = _vmem_capacity_bytes()
    budget = cap // 3                              # ~1/3 of physical VMEM
    divisors = [d for d in range(c, 0, -1) if c % d == 0]
    tc = 1
    for d in divisors:
        if _per_step_vmem_bytes(d, h, w, hp, wp, out_h, out_w, in_isz, out_isz) <= budget:
            tc = d
            break
    # v7x has 2 TensorCores: make sure there are >= 2 "parallel" grid steps.
    if n * (c // tc) < 2:
        smaller = [d for d in divisors if d < tc]
        if smaller:
            tc = smaller[0]
    fp = _per_step_vmem_bytes(tc, h, w, hp, wp, out_h, out_w, in_isz, out_isz)
    vmem_limit = int(min(0.8 * cap, max(3 * fp, 32 * 1024 * 1024)))
    return tc, vmem_limit


# ---------------------------------------------------------------------------
# Wrapper.
def quant_average_pool2d(x, x_scaling_factor=None, *, kernel_size=7,
                         stride=1, padding=0):
    """Forward pass of QuantAveragePool2d. x is NCHW (any float dtype)."""
    n, c, h, w = x.shape
    hp, wp = h + 2 * padding, w + 2 * padding
    out_h = (hp - kernel_size) // stride + 1
    out_w = (wp - kernel_size) // stride + 1

    quant = x_scaling_factor is not None
    # torch: x / scale(float32) promotes, so the quant path emits >= float32.
    out_dtype = jnp.promote_types(x.dtype, jnp.float32) if quant else x.dtype

    tc, vmem_limit = _pick_channel_tile(
        n, c, h, w, hp, wp, out_h, out_w, x.dtype.itemsize, out_dtype.itemsize)

    grid = (n, c // tc)
    x_spec = pl.BlockSpec((pl.Squeezed(), tc, h, w), lambda i, j: (i, j, 0, 0))
    o_spec = pl.BlockSpec((pl.Squeezed(), tc, out_h, out_w),
                          lambda i, j: (i, j, 0, 0))
    out_shape = jax.ShapeDtypeStruct((n, c, out_h, out_w), out_dtype)
    cparams = pltpu.CompilerParams(
        dimension_semantics=("parallel", "parallel"),
        vmem_limit_bytes=vmem_limit)

    if not quant:
        kernel = functools.partial(
            _avgpool_kernel, kernel_size=kernel_size, stride=stride,
            padding=padding, out_h=out_h, out_w=out_w)
        return pl.pallas_call(
            kernel,
            out_shape=out_shape,
            grid=grid,
            in_specs=[x_spec],
            out_specs=o_spec,
            compiler_params=cparams,
        )(x)

    scale = jnp.reshape(x_scaling_factor, (-1,)).astype(jnp.float32)
    assert scale.size == 1, "QuantAveragePool2d expects a scalar activation scale"

    kernel = functools.partial(
        _quant_avgpool_kernel, kernel_size=kernel_size, stride=stride,
        padding=padding, out_h=out_h, out_w=out_w)
    out = pl.pallas_call(
        kernel,
        out_shape=out_shape,
        grid=grid,
        in_specs=[pl.BlockSpec(memory_space=pltpu.MemorySpace.SMEM), x_spec],
        out_specs=o_spec,
        compiler_params=cparams,
    )(scale, x)
    return out, scale


# ---------------------------------------------------------------------------
# Plain-JAX references for verification (NCHW).
def _ref_avgpool(x, k, s, p):
    sums = jax.lax.reduce_window(
        x, 0.0, jax.lax.add, (1, 1, k, k), (1, 1, s, s),
        [(0, 0), (0, 0), (p, p), (p, p)])
    return sums / float(k * k)


def _ref_quant(x, scale, k, s, p):
    scale = jnp.reshape(scale, (-1,)).astype(jnp.float32)
    x_int = jnp.round(x.astype(jnp.float32) / scale)
    pooled = jnp.round(_ref_avgpool(x_int, k, s, p))
    return pooled * scale, scale


if __name__ == "__main__":
    key = jax.random.PRNGKey(0)
    x = jax.random.normal(key, (2, 4, 16, 16), dtype=jnp.float32)
    x_scaling_factor = jnp.array([0.05], dtype=jnp.float32)

    # Case A: default module config (kernel_size=7, stride=1, padding=0).
    K, S, P = 7, 1, 0
    out_plain = jax.block_until_ready(
        quant_average_pool2d(x, None, kernel_size=K, stride=S, padding=P))
    out_q, sf = quant_average_pool2d(x, x_scaling_factor, kernel_size=K,
                                     stride=S, padding=P)
    out_q = jax.block_until_ready(out_q)
    ref_plain = _ref_avgpool(x, K, S, P)
    ref_q, ref_sf = _ref_quant(x, x_scaling_factor, K, S, P)
    assert out_plain.shape == (2, 4, 10, 10)
    assert out_q.shape == (2, 4, 10, 10)
    assert jnp.allclose(out_plain, ref_plain, atol=1e-5, rtol=1e-5)
    assert jnp.allclose(out_q, ref_q, atol=1e-5, rtol=1e-5)
    assert jnp.allclose(sf, ref_sf)

    # Case B: padding handled inside the kernel (in-vreg zero padding).
    K2, S2, P2 = 3, 1, 1
    out_plain2 = jax.block_until_ready(
        quant_average_pool2d(x, None, kernel_size=K2, stride=S2, padding=P2))
    out_q2, _ = quant_average_pool2d(x, x_scaling_factor, kernel_size=K2,
                                     stride=S2, padding=P2)
    out_q2 = jax.block_until_ready(out_q2)
    assert out_plain2.shape == (2, 4, 16, 16)
    assert jnp.allclose(out_plain2, _ref_avgpool(x, K2, S2, P2),
                        atol=1e-5, rtol=1e-5)
    ref_q2, _ = _ref_quant(x, x_scaling_factor, K2, S2, P2)
    assert jnp.allclose(out_q2, ref_q2, atol=1e-5, rtol=1e-5)

    # Case C: native-dtype (bf16) input is DMA'd as-is and cast in-kernel.
    x_bf16 = x.astype(jnp.bfloat16)
    out_bf16 = jax.block_until_ready(
        quant_average_pool2d(x_bf16, None, kernel_size=K, stride=S, padding=P))
    assert out_bf16.dtype == jnp.bfloat16
    assert jnp.allclose(out_bf16.astype(jnp.float32), ref_plain,
                        atol=5e-2, rtol=5e-2)

    print("KERNEL_OK")
</pallas_src>

<mosaic_0001>
module attributes {stable_mosaic.version = 11 : i64} {
  func.func @_avgpool_kernel(%arg0: i32, %arg1: i32, %arg2: memref<1x4x16x16xf32, #tpu.memory_space<vmem>>, %arg3: memref<1x4x10x10xf32, #tpu.memory_space<vmem>>) attributes {dimension_semantics = [#tpu.dimension_semantics<parallel>, #tpu.dimension_semantics<parallel>], iteration_bounds = array<i64: 2, 1>, scalar_prefetch = 0 : i64, scratch_operands = 0 : i64, tpu.core_type = #tpu.core_type<tc>, window_params = [{transform_indices = @transform_0, window_bounds = array<i64: 1, 4, 16, 16>}, {transform_indices = @transform_1, window_bounds = array<i64: 1, 4, 10, 10>}]} {
    %c0 = arith.constant 0 : index
    %c0_0 = arith.constant 0 : index
    %c0_1 = arith.constant 0 : index
    %c0_2 = arith.constant 0 : index
    %0 = vector.load %arg2[%c0, %c0_0, %c0_1, %c0_2] : memref<1x4x16x16xf32, #tpu.memory_space<vmem>>, vector<1x4x16x16xf32>
    %1 = vector.shape_cast %0 : vector<1x4x16x16xf32> to vector<4x16x16xf32>
    %2 = vector.extract_strided_slice %1 {offsets = [0, 0, 0], sizes = [4, 16, 10], strides = [1, 1, 1]} : vector<4x16x16xf32> to vector<4x16x10xf32>
    %3 = vector.extract_strided_slice %1 {offsets = [0, 0, 1], sizes = [4, 16, 10], strides = [1, 1, 1]} : vector<4x16x16xf32> to vector<4x16x10xf32>
    %4 = arith.addf %2, %3 : vector<4x16x10xf32>
    %5 = vector.extract_strided_slice %1 {offsets = [0, 0, 2], sizes = [4, 16, 10], strides = [1, 1, 1]} : vector<4x16x16xf32> to vector<4x16x10xf32>
    %6 = arith.addf %4, %5 : vector<4x16x10xf32>
    %7 = vector.extract_strided_slice %1 {offsets = [0, 0, 3], sizes = [4, 16, 10], strides = [1, 1, 1]} : vector<4x16x16xf32> to vector<4x16x10xf32>
    %8 = arith.addf %6, %7 : vector<4x16x10xf32>
    %9 = vector.extract_strided_slice %1 {offsets = [0, 0, 4], sizes = [4, 16, 10], strides = [1, 1, 1]} : vector<4x16x16xf32> to vector<4x16x10xf32>
    %10 = arith.addf %8, %9 : vector<4x16x10xf32>
    %11 = vector.extract_strided_slice %1 {offsets = [0, 0, 5], sizes = [4, 16, 10], strides = [1, 1, 1]} : vector<4x16x16xf32> to vector<4x16x10xf32>
    %12 = arith.addf %10, %11 : vector<4x16x10xf32>
    %13 = vector.extract_strided_slice %1 {offsets = [0, 0, 6], sizes = [4, 16, 10], strides = [1, 1, 1]} : vector<4x16x16xf32> to vector<4x16x10xf32>
    %14 = arith.addf %12, %13 : vector<4x16x10xf32>
    %15 = vector.extract_strided_slice %14 {offsets = [0, 0, 0], sizes = [4, 10, 10], strides = [1, 1, 1]} : vector<4x16x10xf32> to vector<4x10x10xf32>
    %16 = vector.extract_strided_slice %14 {offsets = [0, 1, 0], sizes = [4, 10, 10], strides = [1, 1, 1]} : vector<4x16x10xf32> to vector<4x10x10xf32>
    %17 = arith.addf %15, %16 : vector<4x10x10xf32>
    %18 = vector.extract_strided_slice %14 {offsets = [0, 2, 0], sizes = [4, 10, 10], strides = [1, 1, 1]} : vector<4x16x10xf32> to vector<4x10x10xf32>
    %19 = arith.addf %17, %18 : vector<4x10x10xf32>
    %20 = vector.extract_strided_slice %14 {offsets = [0, 3, 0], sizes = [4, 10, 10], strides = [1, 1, 1]} : vector<4x16x10xf32> to vector<4x10x10xf32>
    %21 = arith.addf %19, %20 : vector<4x10x10xf32>
    %22 = vector.extract_strided_slice %14 {offsets = [0, 4, 0], sizes = [4, 10, 10], strides = [1, 1, 1]} : vector<4x16x10xf32> to vector<4x10x10xf32>
    %23 = arith.addf %21, %22 : vector<4x10x10xf32>
    %24 = vector.extract_strided_slice %14 {offsets = [0, 5, 0], sizes = [4, 10, 10], strides = [1, 1, 1]} : vector<4x16x10xf32> to vector<4x10x10xf32>
    %25 = arith.addf %23, %24 : vector<4x10x10xf32>
    %26 = vector.extract_strided_slice %14 {offsets = [0, 6, 0], sizes = [4, 10, 10], strides = [1, 1, 1]} : vector<4x16x10xf32> to vector<4x10x10xf32>
    %27 = arith.addf %25, %26 : vector<4x10x10xf32>
    %cst = arith.constant 0.0204081628 : f32
    %28 = vector.broadcast %cst : f32 to vector<4x10x10xf32>
    %29 = arith.mulf %27, %28 : vector<4x10x10xf32>
    %c0_3 = arith.constant 0 : index
    %c0_4 = arith.constant 0 : index
    %c0_5 = arith.constant 0 : index
    %c0_6 = arith.constant 0 : index
    %30 = vector.load %arg3[%c0_3, %c0_4, %c0_5, %c0_6] : memref<1x4x10x10xf32, #tpu.memory_space<vmem>>, vector<1x4x10x10xf32>
    %31 = vector.shape_cast %30 : vector<1x4x10x10xf32> to vector<4x10x10xf32>
    %32 = vector.shape_cast %29 : vector<4x10x10xf32> to vector<1x4x10x10xf32>
    tpu.vector_store %arg3[%c0_3, %c0_4, %c0_5, %c0_6], %32 {strides = array<i32>} : memref<1x4x10x10xf32, #tpu.memory_space<vmem>>, vector<1x4x10x10xf32>,
    return
  }
  func.func @transform_0(%arg0: i32, %arg1: i32) -> (i32, i32, i32, i32) {
    %c0_i32 = arith.constant 0 : i32
    %c0_i32_0 = arith.constant 0 : i32
    %c0_i32_1 = arith.constant 0 : i32
    return %arg0, %arg1, %c0_i32, %c0_i32_0 : i32, i32, i32, i32
  }
  func.func @transform_1(%arg0: i32, %arg1: i32) -> (i32, i32, i32, i32) {
    %c0_i32 = arith.constant 0 : i32
    %c0_i32_0 = arith.constant 0 : i32
    %c0_i32_1 = arith.constant 0 : i32
    return %arg0, %arg1, %c0_i32, %c0_i32_0 : i32, i32, i32, i32
  }
}

</mosaic_0001>

<bundles_post_ra>
// kernel: tpu_custom_call.1
= control target key start
LH: loop header
LB: loop body
LE: loop exit
PB: predicated region body
PF: predicated region fallthrough
CT: control target
= control target key end

     0   :  { %6 = vsyncpa [#allocation3], 0  ;;  %s1113_s0 = inlined_call_operand.hbm [shape: f32[2,4,16,16], index: 0, kind: input, shape index: {}]   ;;  %s1114_s1 = inlined_call_operand.vmem [shape: f32[2,4,10,10], index: 1, kind: output, shape index: {}]  }
   0x1   :  { %8 = vsyncpa [#allocation3 + $0x1], 0  ;;  %s857_s6 = smov 0   ;;  %s859_s7 = smov 0  }
   0x2   :  { %s861_s8 = smov 0   ;;  %s863_s9 = smov 0  }
   0x3   :  { %s865_s10 = smov 0   ;;  %s867_s11 = smov 0  }
   0x4 LB: > { %s679_s12 = sadd.s32 4294967295, %s837_s11   ;;  %s26_s13 = sadd.s32 1, %s833_s10  ;;  %s837_s11 = sphi %s867_s11, %s14_s11   ;;  %s833_s10 = sphi %s865_s10, %s1121_s10   ;;  %s829_s9 = sphi %s863_s9, %s1120_s9   ;;  %s825_s8 = sphi %s861_s8, %s1119_s8   ;;  %s821_s7 = sphi %s859_s7, %s1118_s7   ;;  %s817_s6 = sphi %s857_s6, %s1117_s6  }
   0x5   : > { %p28_p0 = scmp.ge.s32.totalorder %s26_s13, 2  ;;  %s35_s14 = sadd.s32 1, %s825_s8 }
   0x6   : > { %p42_p1 = scmp.ne.s32.totalorder %s825_s8, %s821_s7  ;;  %p43_p2 = scmp.eq.s32.totalorder %s837_s11, 0 }
   0x7   : > { %s1123_s13 = smov (%p28_p0, %s26_s13), 0  ;;  %p48_p4 = scmp.ne.s32.totalorder %s821_s7, %s817_s6 }
   0x8   : > { %p893_p3 = por %p43_p2, %p42_p1  ;;  %s30_s16 = ssub.s32 %s833_s10, %s1123_s13 }
   0x9   : > { %p49_p5 = scmp.eq.s32.totalorder %s679_s12, 0  ;;  %p33_p6 = scmp.eq.s32.totalorder %s30_s16, 0 }
   0xa   : > { %p700_p8 = scmp.lt.s32.totalorder %s837_s11, 2  ;;  %s100_s19 = sand.u32 1, %s825_s8  }
   0xb   : > { %p900_p7 = por %p49_p5, %p48_p4  ;;  %s692_s20 = sshll.u32 %s833_s10, 6 }
   0xc   : > { %s906_s18 = scalar_select %p33_p6, %s825_s8, %s35_s14  }
   0xd   : > { %s683_s21 = sshll.u32 %s100_s19, 6  ;;  %s112_s24 = scalar_lea.hbm %s1113_s0, %s692_s20 }
   0xe   : > { %s113_s25 = sshll.u32 %s112_s24, 4  ;;  %s104_s26 = scalar_lea.vmem [#allocation2], %s683_s21  ;;  %s114_s25 = int_to_ptr.hbm [resolvable:$true] %s113_s25 }
   0xf   : > { %s115_s27 = sshll.u32 %s104_s26, 4  ;;  %p697_p9 = pnand %p700_p8, %p893_p3  ;;  %s116_s27 = int_to_ptr.vmem [resolvable:$true] %s115_s27 }
  0x10   : > { %p686_p10 = scmp.ge.s32.totalorder %s837_s11, 1  ;;  %p123_p11 = scmp.lt.s32.totalorder %s837_s11, 3 }
  0x11   : > { %s101_s28 = scalar_lea.sflag [#allocation3], %s100_s19  ;;  %s839_s29 = smov 128  }
  0x12   : > { %s840_s30 = smov 8   ;;  %p124_p12 = pnand %p686_p10, %p123_p11 }
  0x13   : > { %699 = dma.hbm_to_vmem [thread:$0]  (!%p697_p9), %s114_s25, 1024, %s116_s27, %s101_s28, %s839_s29, %s839_s29, %s840_s30  }
  0x14   : > { %127 = sbr.rel (%p124_p12) target bundleno = 287 (0x11f), region = 24  ;;  %s129_s2 = sand.u32 (!%p124_p12), 1, %s821_s7  }
  0x15   : > { %s687_s3 = sshll.u32 (!%p124_p12), %s129_s2, 6  ;;  %s130_s4 = scalar_lea.sflag (!%p124_p12), [#allocation3], %s129_s2 }
  0x16   : > { %s133_s5 = scalar_lea.vmem (!%p124_p12), [#allocation2], %s687_s3 }
  0x19   : > { %812 = dma.done.wait (%p900_p7), %s130_s4, 1024  }
  0x1a   : > { %814 = vsyncadd (%p900_p7), %s130_s4, 4294966272  ;;  %v922_v0 = vld [vmem:[%s133_s5 + $0x10] sm:$0xff]  ;;  %v924_v1 = vld [vmem:[%s133_s5] sm:$0xff]  ;;  %s841_s6 = smov 127   ;;  %s842_s12 = smov 126   ;;  %vm570_vm0 = vcmask 74752  }
  0x1b   : > { %190 = vrot.lane.b32.xlu1 %v922_v0, %s841_s6  ;;  %186 = vrot.lane.b32.xlu0 %v924_v1, %s841_s6  ;;  %v928_v2 = vld [vmem:[%s133_s5 + $0x20] sm:$0xff]  ;;  %v931_v3 = vld [vmem:[%s133_s5 + $0x18] sm:$0xff]  ;;  %s843_s14 = smov 125   ;;  %s844_s15 = smov 124   ;;  %vm386_vm1 = vcmask 1046528   ;;  %vm415_vm2 = vcmask 1045504  }
  0x1c   : > { %194 = vrot.lane.b32.xlu2 %v928_v2, %s841_s6  ;;  %v933_v4 = vld [vmem:[%s133_s5 + $0x8] sm:$0xff]  ;;  %v940_v6 = vld [vmem:[%s133_s5 + $0x38] sm:$0xff]  ;;  %v942_v7 = vld [vmem:[%s133_s5 + $0x30] sm:$0xff]  ;;  %s845_s16 = smov 123   ;;  %s846_s17 = smov 122   ;;  %vm444_vm3 = vcmask 1044480  }
  0x1d   : > { %v935_v5 = vld [vmem:[%s133_s5 + $0x28] sm:$0xff]  ;;  %p160_p13 = scmp.lt.s32.totalorder %s829_s9, 1  ;;  %vm473_vm4 = vcmask 1043456   ;;  %vm502_vm5 = vcmask 1042432   ;;  %vm531_vm6 = vcmask 1041408   ;;  %vm568_vm7 = vcmask 80896  }
  0x1f   : > { %s1125_s9 = smov (!%p160_p13, %s829_s9), 1 }
  0x20   : > { %s693_s19 = sshll.u32 %s1125_s9, 6 }
  0x21   : > { %s1017_s9 = scalar_lea.vmem %s1114_s1, %s693_s19 }
  0x23   : > { %192 = vrot.lane.b32.xlu1 %v931_v3, %s841_s6  ;;  %188 = vrot.lane.b32.xlu0 %v933_v4, %s841_s6 }
  0x24   : > { %196 = vrot.lane.b32.xlu2 %v935_v5, %s841_s6 }
  0x2b   : > { %200 = vrot.lane.b32.xlu1 %v940_v6, %s841_s6  ;;  %198 = vrot.lane.b32.xlu0 %v942_v7, %s841_s6 }
  0x2c   : > { %218 = vrot.lane.b32.xlu2 %v924_v1, %s842_s12 }
  0x33   : > { %222 = vrot.lane.b32.xlu1 %v922_v0, %s842_s12  ;;  %220 = vrot.lane.b32.xlu0 %v933_v4, %s842_s12 }
  0x34   : > { %224 = vrot.lane.b32.xlu2 %v931_v3, %s842_s12 }
  0x3b   : > { %228 = vrot.lane.b32.xlu1 %v935_v5, %s842_s12  ;;  %226 = vrot.lane.b32.xlu0 %v928_v2, %s842_s12 }
  0x3c   : > { %230 = vrot.lane.b32.xlu2 %v942_v7, %s842_s12 }
  0x43   : > { %250 = vrot.lane.b32.xlu1 %v924_v1, %s843_s14  ;;  %232 = vrot.lane.b32.xlu0 %v940_v6, %s842_s12 }
  0x44   : > { %252 = vrot.lane.b32.xlu2 %v933_v4, %s843_s14 }
  0x4b   : > { %256 = vrot.lane.b32.xlu1 %v931_v3, %s843_s14  ;;  %254 = vrot.lane.b32.xlu0 %v922_v0, %s843_s14 }
  0x4c   : > { %258 = vrot.lane.b32.xlu2 %v928_v2, %s843_s14 }
  0x53   : > { %262 = vrot.lane.b32.xlu1 %v942_v7, %s843_s14  ;;  %260 = vrot.lane.b32.xlu0 %v935_v5, %s843_s14 }
  0x54   : > { %264 = vrot.lane.b32.xlu2 %v940_v6, %s843_s14 }
  0x5b   : > { %284 = vrot.lane.b32.xlu1 %v933_v4, %s844_s15  ;;  %282 = vrot.lane.b32.xlu0 %v924_v1, %s844_s15 }
  0x5c   : > { %286 = vrot.lane.b32.xlu2 %v922_v0, %s844_s15 }
  0x63   : > { %290 = vrot.lane.b32.xlu1 %v928_v2, %s844_s15  ;;  %288 = vrot.lane.b32.xlu0 %v931_v3, %s844_s15 }
  0x64   : > { %292 = vrot.lane.b32.xlu2 %v935_v5, %s844_s15 }
  0x6b   : > { %296 = vrot.lane.b32.xlu1 %v940_v6, %s844_s15  ;;  %294 = vrot.lane.b32.xlu0 %v942_v7, %s844_s15 }
  0x6c   : > { %314 = vrot.lane.b32.xlu2 %v924_v1, %s845_s16 }
  0x73   : > { %318 = vrot.lane.b32.xlu1 %v922_v0, %s845_s16  ;;  %316 = vrot.lane.b32.xlu0 %v933_v4, %s845_s16 }
  0x74   : > { %320 = vrot.lane.b32.xlu2 %v931_v3, %s845_s16 }
  0x76   : > { %v195_v8 = vpop.permute.xlu2 %194 }
  0x77   : > { %v214_v31 = vadd.f32 %v195_v8, %v928_v2 }
  0x7b   : > { %324 = vrot.lane.b32.xlu1 %v935_v5, %s845_s16  ;;  %322 = vrot.lane.b32.xlu0 %v928_v2, %s845_s16 }
  0x7c   : > { %326 = vrot.lane.b32.xlu2 %v942_v7, %s845_s16 }
  0x7e   : > { %v197_v9 = vpop.permute.xlu2 %196 }
  0x7f   : > { %v215_v32 = vadd.f32 %v197_v9, %v935_v5 }
  0x83   : > { %346 = vrot.lane.b32.xlu1 %v924_v1, %s846_s17  ;;  %328 = vrot.lane.b32.xlu0 %v940_v6, %s845_s16 }
  0x84   : > { %348 = vrot.lane.b32.xlu2 %v933_v4, %s846_s17 }
  0x86   : > { %v219_v10 = vpop.permute.xlu2 %218 }
  0x8b   : > { %352 = vrot.lane.b32.xlu1 %v931_v3, %s846_s17  ;;  %350 = vrot.lane.b32.xlu0 %v922_v0, %s846_s17 }
  0x8c   : > { %354 = vrot.lane.b32.xlu2 %v928_v2, %s846_s17 }
  0x8d   : > { %v191_v11 = vpop.permute.xlu1 %190  ;;  %v187_v12 = vpop.permute.xlu0 %186 }
  0x8e   : > { %v210_v13 = vadd.f32 %v187_v12, %v924_v1  ;;  %v225_v14 = vpop.permute.xlu2 %224  ;;  %v212_v26 = vadd.f32 %v191_v11, %v922_v0 }
  0x90   : > { %v242_v15 = vadd.f32 %v219_v10, %v210_v13 }
  0x93   : > { %358 = vrot.lane.b32.xlu1 %v942_v7, %s846_s17  ;;  %356 = vrot.lane.b32.xlu0 %v935_v5, %s846_s17 }
  0x94   : > { %360 = vrot.lane.b32.xlu2 %v940_v6, %s846_s17 }
  0x95   : > { %v193_v16 = vpop.permute.xlu1 %192  ;;  %v189_v17 = vpop.permute.xlu0 %188 }
  0x96   : > { %v213_v18 = vadd.f32 %v193_v16, %v931_v3  ;;  %v231_v19 = vpop.permute.xlu2 %230  ;;  %v211_v54 = vadd.f32 %v189_v17, %v933_v4 }
  0x98   : > { %v245_v20 = vadd.f32 %v225_v14, %v213_v18 }
  0x9d   : > { %v201_v21 = vpop.permute.xlu1 %200  ;;  %v199_v22 = vpop.permute.xlu0 %198 }
  0x9e   : > { %v216_v23 = vadd.f32 %v199_v22, %v942_v7  ;;  %v253_v24 = vpop.permute.xlu2 %252  ;;  %v217_v2 = vadd.f32 %v201_v21, %v940_v6 }
  0xa0   : > { %v248_v25 = vadd.f32 %v231_v19, %v216_v23 }
  0xa5   : > { %v223_v27 = vpop.permute.xlu1 %222  ;;  %v221_v28 = vpop.permute.xlu0 %220 }
  0xa6   : > { %v244_v29 = vadd.f32 %v223_v27, %v212_v26  ;;  %v259_v30 = vpop.permute.xlu2 %258  ;;  %v243_v57 = vadd.f32 %v221_v28, %v211_v54 }
  0xa8   : > { %v275_v58 = vadd.f32 %v253_v24, %v243_v57 }
  0xad   : > { %v229_v33 = vpop.permute.xlu1 %228  ;;  %v227_v34 = vpop.permute.xlu0 %226 }
  0xae   : > { %v247_v35 = vadd.f32 %v229_v33, %v215_v32  ;;  %v246_v36 = vadd.f32 %v227_v34, %v214_v31  ;;  %v265_v37 = vpop.permute.xlu2 %264 }
  0xb0   : > { %v278_v38 = vadd.f32 %v259_v30, %v246_v36 }
  0xb5   : > { %v251_v39 = vpop.permute.xlu1 %250  ;;  %v233_v40 = vpop.permute.xlu0 %232 }
  0xb6   : > { %v287_v41 = vpop.permute.xlu2 %286  ;;  %v274_v7 = vadd.f32 %v251_v39, %v242_v15  ;;  %v249_v10 = vadd.f32 %v233_v40, %v217_v2 }
  0xb8   : > { %v281_v22 = vadd.f32 %v265_v37, %v249_v10 }
  0xbd   : > { %v257_v42 = vpop.permute.xlu1 %256  ;;  %v255_v43 = vpop.permute.xlu0 %254 }
  0xbe   : > { %v293_v44 = vpop.permute.xlu2 %292  ;;  %v276_v11 = vadd.f32 %v255_v43, %v244_v29  ;;  %v277_v14 = vadd.f32 %v257_v42, %v245_v20 }
  0xc0   : > { %v308_v23 = vadd.f32 %v287_v41, %v276_v11 }
  0xc5   : > { %v263_v45 = vpop.permute.xlu1 %262  ;;  %v261_v46 = vpop.permute.xlu0 %260 }
  0xc6   : > { %v315_v47 = vpop.permute.xlu2 %314  ;;  %v279_v16 = vadd.f32 %v261_v46, %v247_v35  ;;  %v280_v19 = vadd.f32 %v263_v45, %v248_v25 }
  0xc8   : > { %v311_v27 = vadd.f32 %v293_v44, %v279_v16 }
  0xcd   : > { %v285_v48 = vpop.permute.xlu1 %284  ;;  %v283_v49 = vpop.permute.xlu0 %282 }
  0xce   : > { %v321_v50 = vpop.permute.xlu2 %320  ;;  %v307_v60 = vadd.f32 %v285_v48, %v275_v58  ;;  %v306_v17 = vadd.f32 %v283_v49, %v274_v7 }
  0xd0   : > { %v338_v29 = vadd.f32 %v315_v47, %v306_v17 }
  0xd5   : > { %v291_v51 = vpop.permute.xlu1 %290  ;;  %v289_v52 = vpop.permute.xlu0 %288 }
  0xd6   : > { %v327_v53 = vpop.permute.xlu2 %326  ;;  %v310_v21 = vadd.f32 %v291_v51, %v278_v38  ;;  %v309_v15 = vadd.f32 %v289_v52, %v277_v14 }
  0xd8   : > { %v341_v33 = vadd.f32 %v321_v50, %v309_v15 }
  0xdd   : > { %v297_v55 = vpop.permute.xlu1 %296  ;;  %v295_v56 = vpop.permute.xlu0 %294 }
  0xde   : > { %v349_v59 = vpop.permute.xlu2 %348  ;;  %v312_v28 = vadd.f32 %v295_v56, %v280_v19  ;;  %v313_v30 = vadd.f32 %v297_v55, %v281_v22 }
  0xe0   : > { %v1012_v39 = vadd.f32 %v327_v53, %v312_v28 }
  0xe5   : > { %v993_v61 = vpop.permute.xlu1 %318  ;;  %v317_v62 = vpop.permute.xlu0 %316 }
  0xe6   : > { %v339_v63 = vadd.f32 %v317_v62, %v307_v60  ;;  %v355_v5 = vpop.permute.xlu2 %354  ;;  %v340_v49 = vadd.f32 %v993_v61, %v308_v23 }
  0xe8   : > { %v995_v0 = vadd.f32 %v349_v59, %v339_v63 }
  0xea   : > { %v388_v1 = vrot.slane %v995_v0, 1  ;;  %v417_v4 = vrot.slane %v995_v0, 2  ;;  %v446_v13 = vrot.slane %v995_v0, 3  ;;  %v475_v18 = vrot.slane %v995_v0, 4 }
  0xeb   : > { %v504_v26 = vrot.slane %v995_v0, 5  ;;  %v533_v32 = vrot.slane %v995_v0, 6 }
  0xec   : > { %v408_v3 = vadd.f32 %v388_v1, %v995_v0 }
  0xed   : > { %v325_v8 = vpop.permute.xlu1 %324  ;;  %v323_v9 = vpop.permute.xlu0 %322 }
  0xee   : > { %v437_v12 = vadd.f32 %v417_v4, %v408_v3  ;;  %v342_v20 = vadd.f32 %v323_v9, %v310_v21  ;;  %v361_v38 = vpop.permute.xlu2 %360  ;;  %v343_v57 = vadd.f32 %v325_v8, %v311_v27 }
  0xf0   : > { %v466_v6 = vadd.f32 %v446_v13, %v437_v12  ;;  %v1019_v40 = vadd.f32 %v355_v5, %v342_v20 }
  0xf2   : > { %v495_v24 = vadd.f32 %v475_v18, %v466_v6  ;;  %v393_v58 = vrot.slane %v1019_v40, 1  ;;  %v422_v59 = vrot.slane %v1019_v40, 2  ;;  %v451_v61 = vrot.slane %v1019_v40, 3 }
  0xf3   : > { %v480_v62 = vrot.slane %v1019_v40, 4 }
  0xf4   : > { %v524_v31 = vadd.f32 %v504_v26, %v495_v24 }
  0xf5   : > { %v347_v25 = vpop.permute.xlu1 %346  ;;  %v329_v34 = vpop.permute.xlu0 %328 }
  0xf6   : > { %v553_v35 = vadd.f32 %v533_v32, %v524_v31  ;;  %v370_v36 = vadd.f32 %v347_v25, %v338_v29  ;;  %v345_v37 = vadd.f32 %v329_v34, %v313_v30 }
  0xf8   : > { %v561_v41 = vmul.f32 0.020408163, %v553_v35  ;;  %v387_v42 = vrot.slane %v370_v36, 1  ;;  %v416_v43 = vrot.slane %v370_v36, 2  ;;  %v445_v44 = vrot.slane %v370_v36, 3 }
  0xf9   : > { %v474_v45 = vrot.slane %v370_v36, 4  ;;  %v503_v46 = vrot.slane %v370_v36, 5  ;;  %v532_v47 = vrot.slane %v370_v36, 6  ;;  %v1021_v48 = vadd.f32 %v361_v38, %v345_v37 }
  0xfa   : > { %571 = vst.msk [vmem:[%s1017_s9 + $0x8] sm:$0x3] %vm570_vm0, %v561_v41  ;;  %v389_v50 = vsel %vm386_vm1, %v387_v42, %v388_v1  ;;  %v418_v51 = vsel %vm415_vm2, %v416_v43, %v417_v4  ;;  %v447_v52 = vsel %vm444_vm3, %v445_v44, %v446_v13  ;;  %v509_v43 = vrot.slane %v1019_v40, 5 }
  0xfb   : > { %v407_v53 = vadd.f32 %v389_v50, %v370_v36  ;;  %v476_v54 = vsel %vm473_vm4, %v474_v45, %v475_v18  ;;  %v505_v55 = vsel %vm502_vm5, %v503_v46, %v504_v26  ;;  %v534_v56 = vsel %vm531_vm6, %v532_v47, %v533_v32 }
  0xfc   : > { %v397_v60 = vrot.slane %v1021_v48, 1  ;;  %v426_v0 = vrot.slane %v1021_v48, 2  ;;  %v455_v4 = vrot.slane %v1021_v48, 3  ;;  %v484_v9 = vrot.slane %v1021_v48, 4 }
  0xfd   : > { %v436_v63 = vadd.f32 %v418_v51, %v407_v53  ;;  %v353_v1 = vpop.permute.xlu1 %352  ;;  %v351_v2 = vpop.permute.xlu0 %350  ;;  %v513_v10 = vrot.slane %v1021_v48, 5  ;;  %v542_v11 = vrot.slane %v1021_v48, 6 }
  0xfe   : > { %v414_v3 = vadd.f32 %v397_v60, %v1021_v48  ;;  %v373_v5 = vadd.f32 %v353_v1, %v341_v33  ;;  %v372_v7 = vadd.f32 %v351_v2, %v340_v49 }
  0xff   : > { %v465_v8 = vadd.f32 %v447_v52, %v436_v63 }
 0x100   : > { %v443_v12 = vadd.f32 %v426_v0, %v414_v3  ;;  %v391_v13 = vrot.slane %v373_v5, 1  ;;  %v420_v14 = vrot.slane %v373_v5, 2  ;;  %v449_v16 = vrot.slane %v373_v5, 3 }
 0x101   : > { %v494_v17 = vadd.f32 %v476_v54, %v465_v8  ;;  %v478_v6 = vrot.slane %v373_v5, 4  ;;  %v507_v18 = vrot.slane %v373_v5, 5  ;;  %v536_v19 = vrot.slane %v373_v5, 6 }
 0x102   : > { %v472_v21 = vadd.f32 %v455_v4, %v443_v12  ;;  %v410_v15 = vadd.f32 %v391_v13, %v373_v5  ;;  %v390_v22 = vrot.slane %v372_v7, 1  ;;  %v419_v23 = vrot.slane %v372_v7, 2 }
 0x103   : > { %v523_v24 = vadd.f32 %v505_v55, %v494_v17  ;;  %v448_v26 = vrot.slane %v372_v7, 3  ;;  %v477_v27 = vrot.slane %v372_v7, 4  ;;  %v506_v28 = vrot.slane %v372_v7, 5 }
 0x104   : > { %v501_v20 = vadd.f32 %v484_v9, %v472_v21  ;;  %v439_v29 = vadd.f32 %v420_v14, %v410_v15  ;;  %v392_v30 = vsel %vm386_vm1, %v390_v22, %v391_v13  ;;  %v421_v31 = vsel %vm415_vm2, %v419_v23, %v420_v14 }
 0x105   : > { %v552_v32 = vadd.f32 %v534_v56, %v523_v24  ;;  %v409_v33 = vadd.f32 %v392_v30, %v372_v7  ;;  %v450_v25 = vsel %vm444_vm3, %v448_v26, %v449_v16  ;;  %v479_v34 = vsel %vm473_vm4, %v477_v27, %v478_v6  ;;  %v359_v35 = vpop.permute.xlu1 %358  ;;  %v357_v36 = vpop.permute.xlu0 %356 }
 0x106   : > { %v530_v37 = vadd.f32 %v513_v10, %v501_v20  ;;  %v468_v38 = vadd.f32 %v449_v16, %v439_v29  ;;  %v508_v41 = vsel %vm502_vm5, %v506_v28, %v507_v18  ;;  %v535_v42 = vrot.slane %v372_v7, 6 }
 0x107   : > { %v560_v44 = vmul.f32 0.020408163, %v552_v32  ;;  %v438_v45 = vadd.f32 %v421_v31, %v409_v33  ;;  %v376_v46 = vadd.f32 %v359_v35, %v1012_v39  ;;  %v375_v51 = vadd.f32 %v357_v36, %v343_v57 }
 0x108   : > { %v559_v47 = vadd.f32 %v542_v11, %v530_v37  ;;  %v497_v49 = vadd.f32 %v478_v6, %v468_v38  ;;  %v537_v50 = vsel %vm531_vm6, %v535_v42, %v536_v19  ;;  %v538_v27 = vrot.slane %v1019_v40, 6 }
 0x109   : > { %569 = vst.msk [vmem:[%s1017_s9] sm:$0xff] %vm568_vm7, %v560_v44  ;;  %v467_v52 = vadd.f32 %v450_v25, %v438_v45  ;;  %v396_v53 = vrot.slane %v376_v46, 1  ;;  %v425_v54 = vrot.slane %v376_v46, 2  ;;  %v454_v55 = vrot.slane %v376_v46, 3 }
 0x10a   : > { %v567_v56 = vmul.f32 0.020408163, %v559_v47  ;;  %v526_v63 = vadd.f32 %v507_v18, %v497_v49  ;;  %v483_v1 = vrot.slane %v376_v46, 4  ;;  %v512_v2 = vrot.slane %v376_v46, 5 }
 0x10b   : > { %v496_v3 = vadd.f32 %v479_v34, %v467_v52  ;;  %v398_v39 = vsel %vm386_vm1, %v396_v53, %v397_v60  ;;  %v427_v5 = vsel %vm415_vm2, %v425_v54, %v426_v0  ;;  %v456_v7 = vsel %vm444_vm3, %v454_v55, %v455_v4 }
 0x10c   : > { %577 = vst.msk [vmem:[%s1017_s9 + $0x38] sm:$0x3] %vm570_vm0, %v567_v56  ;;  %v555_v57 = vadd.f32 %v536_v19, %v526_v63  ;;  %v413_v8 = vadd.f32 %v398_v39, %v376_v46  ;;  %v485_v12 = vsel %vm473_vm4, %v483_v1, %v484_v9  ;;  %v514_v13 = vsel %vm502_vm5, %v512_v2, %v513_v10 }
 0x10d   : > { %v525_v14 = vadd.f32 %v508_v41, %v496_v3  ;;  %v541_v16 = vrot.slane %v376_v46, 6  ;;  %v394_v17 = vrot.slane %v375_v51, 1  ;;  %v423_v6 = vrot.slane %v375_v51, 2 }
 0x10e   : > { %v563_v18 = vmul.f32 0.020408163, %v555_v57  ;;  %v442_v21 = vadd.f32 %v427_v5, %v413_v8  ;;  %v452_v60 = vrot.slane %v375_v51, 3  ;;  %v481_v15 = vrot.slane %v375_v51, 4 }
 0x10f   : > { %v554_v0 = vadd.f32 %v537_v50, %v525_v14  ;;  %v543_v4 = vsel %vm531_vm6, %v541_v16, %v542_v11  ;;  %v395_v9 = vsel %vm386_vm1, %v393_v58, %v394_v17  ;;  %v412_v19 = vadd.f32 %v394_v17, %v375_v51 }
 0x110   : > { %573 = vst.msk [vmem:[%s1017_s9 + $0x18] sm:$0x3] %vm570_vm0, %v563_v18  ;;  %v471_v10 = vadd.f32 %v456_v7, %v442_v21  ;;  %v411_v22 = vadd.f32 %v395_v9, %v1019_v40  ;;  %v424_v23 = vsel %vm415_vm2, %v422_v59, %v423_v6  ;;  %v453_v48 = vsel %vm444_vm3, %v451_v61, %v452_v60 }
 0x111   : > { %v562_v11 = vmul.f32 0.020408163, %v554_v0  ;;  %v441_v24 = vadd.f32 %v423_v6, %v412_v19  ;;  %v482_v58 = vsel %vm473_vm4, %v480_v62, %v481_v15  ;;  %v510_v26 = vrot.slane %v375_v51, 5 }
 0x112   : > { %v500_v28 = vadd.f32 %v485_v12, %v471_v10  ;;  %v440_v20 = vadd.f32 %v424_v23, %v411_v22  ;;  %v539_v29 = vrot.slane %v375_v51, 6 }
 0x113   : > { %572 = vst.msk [vmem:[%s1017_s9 + $0x10] sm:$0xff] %vm568_vm7, %v562_v11  ;;  %v470_v59 = vadd.f32 %v452_v60, %v441_v24  ;;  %v511_v30 = vsel %vm502_vm5, %v509_v43, %v510_v26 }
 0x114   : > { %v529_v61 = vadd.f32 %v514_v13, %v500_v28  ;;  %v469_v31 = vadd.f32 %v453_v48, %v440_v20  ;;  %v540_v32 = vsel %vm531_vm6, %v538_v27, %v539_v29 }
 0x115   : > { %v499_v33 = vadd.f32 %v481_v15, %v470_v59 }
 0x116   : > { %v558_v62 = vadd.f32 %v543_v4, %v529_v61  ;;  %v498_v25 = vadd.f32 %v482_v58, %v469_v31 }
 0x117   : > { %v528_v34 = vadd.f32 %v510_v26, %v499_v33 }
 0x118   : > { %v566_v40 = vmul.f32 0.020408163, %v558_v62  ;;  %v527_v35 = vadd.f32 %v511_v30, %v498_v25 }
 0x119   : > { %v557_v36 = vadd.f32 %v539_v29, %v528_v34 }
 0x11a   : > { %576 = vst.msk [vmem:[%s1017_s9 + $0x30] sm:$0xff] %vm568_vm7, %v566_v40  ;;  %v556_v37 = vadd.f32 %v540_v32, %v527_v35 }
 0x11b   : > { %v565_v38 = vmul.f32 0.020408163, %v557_v36 }
 0x11c   : > { %v564_v41 = vmul.f32 0.020408163, %v556_v37 }
 0x11d   : > { %575 = vst.msk [vmem:[%s1017_s9 + $0x28] sm:$0x3] %vm570_vm0, %v565_v38 }
 0x11e   : > { %574 = vst.msk [vmem:[%s1017_s9 + $0x20] sm:$0xff] %vm568_vm7, %v564_v41 }
 0x11f PF: > { %s14_s11 = sadd.s32 1, %s837_s11   ;;  %s1117_s6 = smov %s821_s7 }
 0x120   : > { %p11_p0 = scmp.ge.s32.totalorder %s14_s11, 4   ;;  %s1118_s7 = smov %s825_s8 }
 0x121   : > { %s1119_s8 = smov %s906_s18  ;;  %s1120_s9 = smov %s833_s10 }
 0x122   : > { %s1121_s10 = smov %s1123_s13  ;;  %13 = sbr.rel (!%p11_p0) target bundleno = 4 (0x4), region = 64 }
 0x127   :  { %610 = vsyncpa [#allocation3], 1 }
 0x128   :  { %612 = vsyncpa [#allocation3 + $0x1], 1 }

</bundles_post_ra>
